<compile_context>
chip_gen: v5e
topology: v5e:2x2
jax: 0.10.0
libtpu: 0.0.40
codegen_flags: <defaults>
</compile_context>

<pallas_src>
import functools

import jax
import jax.numpy as jnp
from jax.experimental import pallas as pl
from jax.experimental.pallas import tpu as pltpu

BN_EPS = 1e-5
LANE = 128
MAX_TILE_B = 1024      # batch rows per grid step; fits v5e's 16 MiB scoped VMEM


# --------------------------------------------------------------------------- #
# Fused kernel: [linear1 + BN1 stats] -> [BN1 + linear2 + BN2 stats]
#               -> [BN2 + linear3], h1/h2 resident in VMEM scratch.
# --------------------------------------------------------------------------- #
def _fused_mlp_kernel(x_ref, w1_ref, w2_ref, w3_ref, bn_ref, o_ref,
                      h1_s, h2_s, sum_s, ssq_s, sc_s, sh_s,
                      *, tb, n_valid, inv_n, needs_mask):
    phase = pl.program_id(0)
    i = pl.program_id(1)

    def accumulate_stats(h):
        sum_s[...] += jnp.sum(h, axis=0, keepdims=True)
        ssq_s[...] += jnp.sum(h * h, axis=0, keepdims=True)

    def finalize_bn(gamma, beta):
        # Fold full-batch BN into a per-channel affine: y = h * scale + shift.
        mu = sum_s[...] * inv_n
        var = jnp.maximum(ssq_s[...] * inv_n - mu * mu, 0.0)  # biased var (PyTorch)
        scale = gamma * jax.lax.rsqrt(var + BN_EPS)
        sc_s[...] = scale
        sh_s[...] = beta - mu * scale
        sum_s[...] = jnp.zeros_like(sum_s)
        ssq_s[...] = jnp.zeros_like(ssq_s)

    @pl.when(jnp.logical_and(phase == 0, i == 0))
    def _init():
        sum_s[...] = jnp.zeros_like(sum_s)
        ssq_s[...] = jnp.zeros_like(ssq_s)

    # ---- phase 0: linear1, stash h1 in VMEM, accumulate BN1 stats ----------
    @pl.when(phase == 0)
    def _phase0():
        h = jnp.dot(x_ref[...].astype(jnp.bfloat16), w1_ref[...],
                    preferred_element_type=jnp.float32)
        h1_s[i] = h
        accumulate_stats(h)        # padded (zero) x rows contribute nothing

    # ---- phase 1: BN1 affine, linear2, stash h2, accumulate BN2 stats ------
    @pl.when(jnp.logical_and(phase == 1, i == 0))
    def _finalize_bn1():
        finalize_bn(bn_ref[0:1, :], bn_ref[1:2, :])

    @pl.when(phase == 1)
    def _phase1():
        h1n = h1_s[i] * sc_s[...] + sh_s[...]
        if needs_mask:
            # BN1's shift makes padded batch rows nonzero; re-zero them so the
            # BN2 statistics stay exact for the true batch size.
            rows = i * tb + jax.lax.broadcasted_iota(jnp.int32, h1n.shape, 0)
            h1n = jnp.where(rows < n_valid, h1n, 0.0)
        h = jnp.dot(h1n.astype(jnp.bfloat16), w2_ref[...],
                    preferred_element_type=jnp.float32)
        h2_s[i] = h
        accumulate_stats(h)

    # ---- phase 2: BN2 affine, linear3 -> lane-dense padded logits ----------
    @pl.when(jnp.logical_and(phase == 2, i == 0))
    def _finalize_bn2():
        finalize_bn(bn_ref[2:3, :], bn_ref[3:4, :])

    @pl.when(phase == 2)
    def _phase2():
        h2n = h2_s[i] * sc_s[...] + sh_s[...]
        o_ref[...] = jnp.dot(h2n.astype(jnp.bfloat16), w3_ref[...],
                             preferred_element_type=jnp.float32)


# --------------------------------------------------------------------------- #
# Wrapper
# --------------------------------------------------------------------------- #
def _pad_to(a, rows, cols):
    out = jnp.zeros((rows, cols), a.dtype)
    return out.at[: a.shape[0], : a.shape[1]].set(a)


def prepare_params(params):
    """One-time parameter prep (hoisted out of the forward): pad to 128 lanes,
    cast matmul weights to bf16, stack gamma/beta into one sublane-aligned block."""
    w1, g1, b1, w2, g2, b2, w3 = params
    f_in, width = w1.shape
    n_out = w3.shape[1]
    wp = max(LANE, -(-width // LANE) * LANE)    # padded hidden width
    op = max(LANE, -(-n_out // LANE) * LANE)    # padded logits width
    w1p = _pad_to(w1.astype(jnp.float32), f_in, wp).astype(jnp.bfloat16)
    w2p = _pad_to(w2.astype(jnp.float32), wp, wp).astype(jnp.bfloat16)
    w3p = _pad_to(w3.astype(jnp.float32), wp, op).astype(jnp.bfloat16)
    bnp = jnp.zeros((8, wp), jnp.float32)       # rows: g1, b1, g2, b2, pad
    bnp = bnp.at[0, :width].set(g1.reshape(-1).astype(jnp.float32))
    bnp = bnp.at[1, :width].set(b1.reshape(-1).astype(jnp.float32))
    bnp = bnp.at[2, :width].set(g2.reshape(-1).astype(jnp.float32))
    bnp = bnp.at[3, :width].set(b2.reshape(-1).astype(jnp.float32))
    return w1p, w2p, w3p, bnp, n_out


@functools.partial(jax.jit, static_argnames=("n_out",))
def mlp_linear_forward(x, w1p, w2p, w3p, bnp, *, n_out):
    """x: (B, 1, 28, 28) or anything flattening to (B, 784). Returns (B, n_out) f32."""
    B = x.shape[0]
    x2d = x.reshape(B, -1).astype(jnp.float32)
    f_in = x2d.shape[1]
    assert f_in == w1p.shape[0], (f_in, w1p.shape)
    wp = w1p.shape[1]
    op = w3p.shape[1]

    # Batch tiling: pad B up to a tile multiple with zero rows (masked in-kernel).
    tb = min(MAX_TILE_B, -(-B // 8) * 8)
    nt = -(-B // tb)
    b_pad = nt * tb
    if b_pad != B:
        x2d = jnp.zeros((b_pad, f_in), jnp.float32).at[:B].set(x2d)

    kernel = functools.partial(_fused_mlp_kernel, tb=tb, n_valid=B,
                               inv_n=1.0 / B, needs_mask=(b_pad != B))

    # Phase-pinned index maps: x only advances in phase 0, logits only in phase 2.
    x_spec = pl.BlockSpec((tb, f_in), lambda p, i: (jnp.where(p == 0, i, 0), 0))
    out_spec = pl.BlockSpec((tb, op), lambda p, i: (jnp.where(p == 2, i, 0), 0))
    const = lambda r, c: pl.BlockSpec((r, c), lambda p, i: (0, 0))

    # VMEM estimate (double-buffered tiles + weights + resident h1/h2 scratch);
    # raise the scoped limit only when the default (16 MiB on v5e) is too small.
    est = (2 * tb * f_in * 4 + 2 * tb * op * 4
           + 2 * 2 * (f_in * wp + wp * wp + wp * op) + 2 * 8 * wp * 4
           + 2 * b_pad * wp * 4 + 4 * wp * 4)
    cp = dict(dimension_semantics=("arbitrary", "arbitrary"))
    if est > 16 * 1024 * 1024:
        cp["vmem_limit_bytes"] = min(int(est * 1.25), 128 * 1024 * 1024)

    out_p = pl.pallas_call(
        kernel,
        grid=(3, nt),
        in_specs=[x_spec, const(f_in, wp), const(wp, wp), const(wp, op),
                  const(8, wp)],
        out_specs=out_spec,
        out_shape=jax.ShapeDtypeStruct((b_pad, op), jnp.float32),
        scratch_shapes=[
            pltpu.VMEM((nt, tb, wp), jnp.float32),   # h1 (VMEM-resident)
            pltpu.VMEM((nt, tb, wp), jnp.float32),   # h2 (VMEM-resident)
            pltpu.VMEM((1, wp), jnp.float32),        # running sum
            pltpu.VMEM((1, wp), jnp.float32),        # running sum of squares
            pltpu.VMEM((1, wp), jnp.float32),        # BN scale
            pltpu.VMEM((1, wp), jnp.float32),        # BN shift
        ],
        compiler_params=pltpu.CompilerParams(**cp),
        cost_estimate=pl.CostEstimate(
            flops=2 * b_pad * (f_in * wp + wp * wp + wp * op),
            transcendentals=0,
            bytes_accessed=(b_pad * f_in * 4 + b_pad * op * 4
                            + 2 * (f_in * wp + wp * wp + wp * op))),
    )(x2d, w1p, w2p, w3p, bnp)

    return out_p[:B, :n_out]


# --------------------------------------------------------------------------- #
# Parameters / reference
# --------------------------------------------------------------------------- #
def init_params(width, key):
    """Deterministic synthetic parameters (conv1x1 layers are bias-free)."""
    k1, k2, k3, k4, k5 = jax.random.split(key, 5)
    w1 = jax.random.normal(k1, (784, width), jnp.float32) * 0.02    # linear1 weight^T
    w2 = jax.random.normal(k2, (width, width), jnp.float32) * 0.05  # linear2 weight^T
    w3 = jax.random.normal(k3, (width, 10), jnp.float32) * 0.05     # linear3 weight^T
    g1 = 1.0 + 0.1 * jax.random.normal(k4, (1, width), jnp.float32)
    b1 = 0.1 * jax.random.normal(k5, (1, width), jnp.float32)
    g2 = jnp.ones((1, width), jnp.float32)
    b2 = jnp.zeros((1, width), jnp.float32)
    return (w1, g1, b1, w2, g2, b2, w3)


def reference_forward(x, params):
    """Pure-JAX f32 reference of the same forward pass."""
    B = x.shape[0]
    h = x.reshape(B, -1).astype(jnp.float32)
    w1, g1, b1, w2, g2, b2, w3 = params

    def bn(h, g, b):
        mu = h.mean(0, keepdims=True)
        var = ((h - mu) ** 2).mean(0, keepdims=True)
        return (h - mu) / jnp.sqrt(var + BN_EPS) * g + b

    h = bn(h @ w1, g1, b1)
    h = bn(h @ w2, g2, b2)
    return h @ w3


if __name__ == "__main__":
    width = 32
    B = 8
    key = jax.random.PRNGKey(0)
    kx, kp = jax.random.split(key)
    x = jax.random.normal(kx, (B, 1, 28, 28), jnp.float32)   # MNIST-like NCHW input
    params = init_params(width, kp)

    w1p, w2p, w3p, bnp, n_out = prepare_params(params)       # one-time prep
    out = jax.block_until_ready(
        mlp_linear_forward(x, w1p, w2p, w3p, bnp, n_out=n_out))
    ref = reference_forward(x, params)

    assert out.shape == (B, 10), out.shape
    err = float(jnp.max(jnp.abs(out - ref)))
    # Kernel uses bf16 MXU operands (f32 accumulation); reference is all-f32,
    # so compare with a correspondingly loose tolerance.
    assert jnp.allclose(out, ref, atol=3e-2, rtol=3e-2), err
    print("KERNEL_OK")
</pallas_src>

<mosaic_0001>
module attributes {stable_mosaic.version = 11 : i64} {
  func.func @_fused_mlp_kernel(%arg0: i32, %arg1: i32, %arg2: memref<8x784xf32, #tpu.memory_space<vmem>>, %arg3: memref<784x128xbf16, #tpu.memory_space<vmem>>, %arg4: memref<128x128xbf16, #tpu.memory_space<vmem>>, %arg5: memref<128x128xbf16, #tpu.memory_space<vmem>>, %arg6: memref<8x128xf32, #tpu.memory_space<vmem>>, %arg7: memref<8x128xf32, #tpu.memory_space<vmem>>, %arg8: memref<1x8x128xf32, #tpu.memory_space<vmem>>, %arg9: memref<1x8x128xf32, #tpu.memory_space<vmem>>, %arg10: memref<1x128xf32, #tpu.memory_space<vmem>>, %arg11: memref<1x128xf32, #tpu.memory_space<vmem>>, %arg12: memref<1x128xf32, #tpu.memory_space<vmem>>, %arg13: memref<1x128xf32, #tpu.memory_space<vmem>>) attributes {dimension_semantics = [#tpu.dimension_semantics<arbitrary>, #tpu.dimension_semantics<arbitrary>], iteration_bounds = array<i64: 3, 1>, scalar_prefetch = 0 : i64, scratch_operands = 6 : i64, tpu.core_type = #tpu.core_type<tc>, window_params = [{transform_indices = @transform_0, window_bounds = array<i64: 8, 784>}, {pipeline_mode = #tpu.pipeline_mode<synchronous>, transform_indices = @transform_1, window_bounds = array<i64: 784, 128>}, {pipeline_mode = #tpu.pipeline_mode<synchronous>, transform_indices = @transform_2, window_bounds = array<i64: 128, 128>}, {pipeline_mode = #tpu.pipeline_mode<synchronous>, transform_indices = @transform_3, window_bounds = array<i64: 128, 128>}, {pipeline_mode = #tpu.pipeline_mode<synchronous>, transform_indices = @transform_4, window_bounds = array<i64: 8, 128>}, {transform_indices = @transform_5, window_bounds = array<i64: 8, 128>}]} {
    %c0_i32 = arith.constant 0 : i32
    %0 = arith.cmpi eq, %arg0, %c0_i32 : i32
    %c0_i32_0 = arith.constant 0 : i32
    %1 = arith.cmpi eq, %arg1, %c0_i32_0 : i32
    %2 = arith.andi %0, %1 : i1
    %3 = arith.extui %2 : i1 to i32
    %c0_i32_1 = arith.constant 0 : i32
    %4 = arith.cmpi ne, %3, %c0_i32_1 : i32
    scf.if %4 {
      %cst = arith.constant 0.000000e+00 : f32
      %24 = vector.broadcast %cst : f32 to vector<1x128xf32>
      %c0 = arith.constant 0 : index
      %c0_12 = arith.constant 0 : index
      %25 = vector.load %arg10[%c0, %c0_12] : memref<1x128xf32, #tpu.memory_space<vmem>>, vector<1x128xf32>
      tpu.vector_store %arg10[%c0, %c0_12], %24 {strides = array<i32>} : memref<1x128xf32, #tpu.memory_space<vmem>>, vector<1x128xf32>,
      %cst_13 = arith.constant 0.000000e+00 : f32
      %26 = vector.broadcast %cst_13 : f32 to vector<1x128xf32>
      %c0_14 = arith.constant 0 : index
      %c0_15 = arith.constant 0 : index
      %27 = vector.load %arg11[%c0_14, %c0_15] : memref<1x128xf32, #tpu.memory_space<vmem>>, vector<1x128xf32>
      tpu.vector_store %arg11[%c0_14, %c0_15], %26 {strides = array<i32>} : memref<1x128xf32, #tpu.memory_space<vmem>>, vector<1x128xf32>,
    } else {
    }
    %c0_i32_2 = arith.constant 0 : i32
    %5 = arith.cmpi eq, %arg0, %c0_i32_2 : i32
    %6 = arith.extui %5 : i1 to i32
    %c0_i32_3 = arith.constant 0 : i32
    %7 = arith.cmpi ne, %6, %c0_i32_3 : i32
    scf.if %7 {
      %c0 = arith.constant 0 : index
      %c0_12 = arith.constant 0 : index
      %24 = vector.load %arg2[%c0, %c0_12] : memref<8x784xf32, #tpu.memory_space<vmem>>, vector<8x784xf32>
      %25 = arith.truncf %24 : vector<8x784xf32> to vector<8x784xbf16>
      %c0_13 = arith.constant 0 : index
      %c0_14 = arith.constant 0 : index
      %26 = vector.load %arg3[%c0_13, %c0_14] : memref<784x128xbf16, #tpu.memory_space<vmem>>, vector<784x128xbf16>
      %cst = arith.constant dense<0.000000e+00> : vector<8x128xf32>
      %27 = tpu.matmul %25, %26, %cst {dimension_numbers = #tpu.dot_dimension_numbers<[1], [0], [0], [1], [0, 0, 1, 1], [], []>} : vector<8x784xbf16>, vector<784x128xbf16>, vector<8x128xf32> -> vector<8x128xf32>
      %28 = arith.index_cast %arg1 : i32 to index
      %c0_15 = arith.constant 0 : index
      %c0_16 = arith.constant 0 : index
      %29 = vector.load %arg8[%28, %c0_15, %c0_16] : memref<1x8x128xf32, #tpu.memory_space<vmem>>, vector<1x8x128xf32>
      %30 = vector.shape_cast %29 : vector<1x8x128xf32> to vector<8x128xf32>
      %31 = vector.shape_cast %27 : vector<8x128xf32> to vector<1x8x128xf32>
      tpu.vector_store %arg8[%28, %c0_15, %c0_16], %31 {strides = array<i32>} : memref<1x8x128xf32, #tpu.memory_space<vmem>>, vector<1x8x128xf32>,
      %c0_17 = arith.constant 0 : index
      %c0_18 = arith.constant 0 : index
      %32 = vector.load %arg10[%c0_17, %c0_18] : memref<1x128xf32, #tpu.memory_space<vmem>>, vector<1x128xf32>
      %cst_19 = arith.constant dense<0.000000e+00> : vector<128xf32>
      %33 = vector.multi_reduction <add>, %27, %cst_19 [0] : vector<8x128xf32> to vector<128xf32>
      %34 = vector.shape_cast %33 : vector<128xf32> to vector<1x128xf32>
      %35 = arith.addf %32, %34 : vector<1x128xf32>
      %c0_20 = arith.constant 0 : index
      %c0_21 = arith.constant 0 : index
      %36 = vector.load %arg10[%c0_20, %c0_21] : memref<1x128xf32, #tpu.memory_space<vmem>>, vector<1x128xf32>
      tpu.vector_store %arg10[%c0_20, %c0_21], %35 {strides = array<i32>} : memref<1x128xf32, #tpu.memory_space<vmem>>, vector<1x128xf32>,
      %c0_22 = arith.constant 0 : index
      %c0_23 = arith.constant 0 : index
      %37 = vector.load %arg11[%c0_22, %c0_23] : memref<1x128xf32, #tpu.memory_space<vmem>>, vector<1x128xf32>
      %38 = arith.mulf %27, %27 : vector<8x128xf32>
      %cst_24 = arith.constant dense<0.000000e+00> : vector<128xf32>
      %39 = vector.multi_reduction <add>, %38, %cst_24 [0] : vector<8x128xf32> to vector<128xf32>
      %40 = vector.shape_cast %39 : vector<128xf32> to vector<1x128xf32>
      %41 = arith.addf %37, %40 : vector<1x128xf32>
      %c0_25 = arith.constant 0 : index
      %c0_26 = arith.constant 0 : index
      %42 = vector.load %arg11[%c0_25, %c0_26] : memref<1x128xf32, #tpu.memory_space<vmem>>, vector<1x128xf32>
      tpu.vector_store %arg11[%c0_25, %c0_26], %41 {strides = array<i32>} : memref<1x128xf32, #tpu.memory_space<vmem>>, vector<1x128xf32>,
    } else {
    }
    %c1_i32 = arith.constant 1 : i32
    %8 = arith.cmpi eq, %arg0, %c1_i32 : i32
    %c0_i32_4 = arith.constant 0 : i32
    %9 = arith.cmpi eq, %arg1, %c0_i32_4 : i32
    %10 = arith.andi %8, %9 : i1
    %11 = arith.extui %10 : i1 to i32
    %c0_i32_5 = arith.constant 0 : i32
    %12 = arith.cmpi ne, %11, %c0_i32_5 : i32
    scf.if %12 {
      %c0 = arith.constant 0 : index
      %c0_12 = arith.constant 0 : index
      %24 = vector.load %arg6[%c0, %c0_12] : memref<8x128xf32, #tpu.memory_space<vmem>>, vector<1x128xf32>
      %c1 = arith.constant 1 : index
      %c0_13 = arith.constant 0 : index
      %25 = vector.load %arg6[%c1, %c0_13] : memref<8x128xf32, #tpu.memory_space<vmem>>, vector<1x128xf32>
      %c0_14 = arith.constant 0 : index
      %c0_15 = arith.constant 0 : index
      %26 = vector.load %arg10[%c0_14, %c0_15] : memref<1x128xf32, #tpu.memory_space<vmem>>, vector<1x128xf32>
      %cst = arith.constant 1.250000e-01 : f32
      %27 = vector.broadcast %cst : f32 to vector<1x128xf32>
      %28 = arith.mulf %26, %27 : vector<1x128xf32>
      %c0_16 = arith.constant 0 : index
      %c0_17 = arith.constant 0 : index
      %29 = vector.load %arg11[%c0_16, %c0_17] : memref<1x128xf32, #tpu.memory_space<vmem>>, vector<1x128xf32>
      %cst_18 = arith.constant 1.250000e-01 : f32
      %30 = vector.broadcast %cst_18 : f32 to vector<1x128xf32>
      %31 = arith.mulf %29, %30 : vector<1x128xf32>
      %32 = arith.mulf %28, %28 : vector<1x128xf32>
      %33 = arith.subf %31, %32 : vector<1x128xf32>
      %cst_19 = arith.constant 0.000000e+00 : f32
      %34 = vector.broadcast %cst_19 : f32 to vector<1x128xf32>
      %35 = arith.maximumf %33, %34 : vector<1x128xf32>
      %cst_20 = arith.constant 9.99999974E-6 : f32
      %36 = vector.broadcast %cst_20 : f32 to vector<1x128xf32>
      %37 = arith.addf %35, %36 : vector<1x128xf32>
      %38 = math.rsqrt %37 : vector<1x128xf32>
      %39 = arith.mulf %24, %38 : vector<1x128xf32>
      %c0_21 = arith.constant 0 : index
      %c0_22 = arith.constant 0 : index
      %40 = vector.load %arg12[%c0_21, %c0_22] : memref<1x128xf32, #tpu.memory_space<vmem>>, vector<1x128xf32>
      tpu.vector_store %arg12[%c0_21, %c0_22], %39 {strides = array<i32>} : memref<1x128xf32, #tpu.memory_space<vmem>>, vector<1x128xf32>,
      %41 = arith.mulf %28, %39 : vector<1x128xf32>
      %42 = arith.subf %25, %41 : vector<1x128xf32>
      %c0_23 = arith.constant 0 : index
      %c0_24 = arith.constant 0 : index
      %43 = vector.load %arg13[%c0_23, %c0_24] : memref<1x128xf32, #tpu.memory_space<vmem>>, vector<1x128xf32>
      tpu.vector_store %arg13[%c0_23, %c0_24], %42 {strides = array<i32>} : memref<1x128xf32, #tpu.memory_space<vmem>>, vector<1x128xf32>,
      %cst_25 = arith.constant 0.000000e+00 : f32
      %44 = vector.broadcast %cst_25 : f32 to vector<1x128xf32>
      %c0_26 = arith.constant 0 : index
      %c0_27 = arith.constant 0 : index
      %45 = vector.load %arg10[%c0_26, %c0_27] : memref<1x128xf32, #tpu.memory_space<vmem>>, vector<1x128xf32>
      tpu.vector_store %arg10[%c0_26, %c0_27], %44 {strides = array<i32>} : memref<1x128xf32, #tpu.memory_space<vmem>>, vector<1x128xf32>,
      %cst_28 = arith.constant 0.000000e+00 : f32
      %46 = vector.broadcast %cst_28 : f32 to vector<1x128xf32>
      %c0_29 = arith.constant 0 : index
      %c0_30 = arith.constant 0 : index
      %47 = vector.load %arg11[%c0_29, %c0_30] : memref<1x128xf32, #tpu.memory_space<vmem>>, vector<1x128xf32>
      tpu.vector_store %arg11[%c0_29, %c0_30], %46 {strides = array<i32>} : memref<1x128xf32, #tpu.memory_space<vmem>>, vector<1x128xf32>,
    } else {
    }
    %c1_i32_6 = arith.constant 1 : i32
    %13 = arith.cmpi eq, %arg0, %c1_i32_6 : i32
    %14 = arith.extui %13 : i1 to i32
    %c0_i32_7 = arith.constant 0 : i32
    %15 = arith.cmpi ne, %14, %c0_i32_7 : i32
    scf.if %15 {
      %24 = arith.index_cast %arg1 : i32 to index
      %c0 = arith.constant 0 : index
      %c0_12 = arith.constant 0 : index
      %25 = vector.load %arg8[%24, %c0, %c0_12] : memref<1x8x128xf32, #tpu.memory_space<vmem>>, vector<1x8x128xf32>
      %26 = vector.shape_cast %25 : vector<1x8x128xf32> to vector<8x128xf32>
      %c0_13 = arith.constant 0 : index
      %c0_14 = arith.constant 0 : index
      %27 = vector.load %arg12[%c0_13, %c0_14] : memref<1x128xf32, #tpu.memory_space<vmem>>, vector<1x128xf32>
      %28 = vector.broadcast %27 : vector<1x128xf32> to vector<8x128xf32>
      %29 = arith.mulf %26, %28 : vector<8x128xf32>
      %c0_15 = arith.constant 0 : index
      %c0_16 = arith.constant 0 : index
      %30 = vector.load %arg13[%c0_15, %c0_16] : memref<1x128xf32, #tpu.memory_space<vmem>>, vector<1x128xf32>
      %31 = vector.broadcast %30 : vector<1x128xf32> to vector<8x128xf32>
      %32 = arith.addf %29, %31 : vector<8x128xf32>
      %33 = arith.truncf %32 : vector<8x128xf32> to vector<8x128xbf16>
      %c0_17 = arith.constant 0 : index
      %c0_18 = arith.constant 0 : index
      %34 = vector.load %arg4[%c0_17, %c0_18] : memref<128x128xbf16, #tpu.memory_space<vmem>>, vector<128x128xbf16>
      %cst = arith.constant dense<0.000000e+00> : vector<8x128xf32>
      %35 = tpu.matmul %33, %34, %cst {dimension_numbers = #tpu.dot_dimension_numbers<[1], [0], [0], [1], [0, 0, 1, 1], [], []>} : vector<8x128xbf16>, vector<128x128xbf16>, vector<8x128xf32> -> vector<8x128xf32>
      %36 = arith.index_cast %arg1 : i32 to index
      %c0_19 = arith.constant 0 : index
      %c0_20 = arith.constant 0 : index
      %37 = vector.load %arg9[%36, %c0_19, %c0_20] : memref<1x8x128xf32, #tpu.memory_space<vmem>>, vector<1x8x128xf32>
      %38 = vector.shape_cast %37 : vector<1x8x128xf32> to vector<8x128xf32>
      %39 = vector.shape_cast %35 : vector<8x128xf32> to vector<1x8x128xf32>
      tpu.vector_store %arg9[%36, %c0_19, %c0_20], %39 {strides = array<i32>} : memref<1x8x128xf32, #tpu.memory_space<vmem>>, vector<1x8x128xf32>,
      %c0_21 = arith.constant 0 : index
      %c0_22 = arith.constant 0 : index
      %40 = vector.load %arg10[%c0_21, %c0_22] : memref<1x128xf32, #tpu.memory_space<vmem>>, vector<1x128xf32>
      %cst_23 = arith.constant dense<0.000000e+00> : vector<128xf32>
      %41 = vector.multi_reduction <add>, %35, %cst_23 [0] : vector<8x128xf32> to vector<128xf32>
      %42 = vector.shape_cast %41 : vector<128xf32> to vector<1x128xf32>
      %43 = arith.addf %40, %42 : vector<1x128xf32>
      %c0_24 = arith.constant 0 : index
      %c0_25 = arith.constant 0 : index
      %44 = vector.load %arg10[%c0_24, %c0_25] : memref<1x128xf32, #tpu.memory_space<vmem>>, vector<1x128xf32>
      tpu.vector_store %arg10[%c0_24, %c0_25], %43 {strides = array<i32>} : memref<1x128xf32, #tpu.memory_space<vmem>>, vector<1x128xf32>,
      %c0_26 = arith.constant 0 : index
      %c0_27 = arith.constant 0 : index
      %45 = vector.load %arg11[%c0_26, %c0_27] : memref<1x128xf32, #tpu.memory_space<vmem>>, vector<1x128xf32>
      %46 = arith.mulf %35, %35 : vector<8x128xf32>
      %cst_28 = arith.constant dense<0.000000e+00> : vector<128xf32>
      %47 = vector.multi_reduction <add>, %46, %cst_28 [0] : vector<8x128xf32> to vector<128xf32>
      %48 = vector.shape_cast %47 : vector<128xf32> to vector<1x128xf32>
      %49 = arith.addf %45, %48 : vector<1x128xf32>
      %c0_29 = arith.constant 0 : index
      %c0_30 = arith.constant 0 : index
      %50 = vector.load %arg11[%c0_29, %c0_30] : memref<1x128xf32, #tpu.memory_space<vmem>>, vector<1x128xf32>
      tpu.vector_store %arg11[%c0_29, %c0_30], %49 {strides = array<i32>} : memref<1x128xf32, #tpu.memory_space<vmem>>, vector<1x128xf32>,
    } else {
    }
    %c2_i32 = arith.constant 2 : i32
    %16 = arith.cmpi eq, %arg0, %c2_i32 : i32
    %c0_i32_8 = arith.constant 0 : i32
    %17 = arith.cmpi eq, %arg1, %c0_i32_8 : i32
    %18 = arith.andi %16, %17 : i1
    %19 = arith.extui %18 : i1 to i32
    %c0_i32_9 = arith.constant 0 : i32
    %20 = arith.cmpi ne, %19, %c0_i32_9 : i32
    scf.if %20 {
      %c2 = arith.constant 2 : index
      %c0 = arith.constant 0 : index
      %24 = vector.load %arg6[%c2, %c0] : memref<8x128xf32, #tpu.memory_space<vmem>>, vector<1x128xf32>
      %c3 = arith.constant 3 : index
      %c0_12 = arith.constant 0 : index
      %25 = vector.load %arg6[%c3, %c0_12] : memref<8x128xf32, #tpu.memory_space<vmem>>, vector<1x128xf32>
      %c0_13 = arith.constant 0 : index
      %c0_14 = arith.constant 0 : index
      %26 = vector.load %arg10[%c0_13, %c0_14] : memref<1x128xf32, #tpu.memory_space<vmem>>, vector<1x128xf32>
      %cst = arith.constant 1.250000e-01 : f32
      %27 = vector.broadcast %cst : f32 to vector<1x128xf32>
      %28 = arith.mulf %26, %27 : vector<1x128xf32>
      %c0_15 = arith.constant 0 : index
      %c0_16 = arith.constant 0 : index
      %29 = vector.load %arg11[%c0_15, %c0_16] : memref<1x128xf32, #tpu.memory_space<vmem>>, vector<1x128xf32>
      %cst_17 = arith.constant 1.250000e-01 : f32
      %30 = vector.broadcast %cst_17 : f32 to vector<1x128xf32>
      %31 = arith.mulf %29, %30 : vector<1x128xf32>
      %32 = arith.mulf %28, %28 : vector<1x128xf32>
      %33 = arith.subf %31, %32 : vector<1x128xf32>
      %cst_18 = arith.constant 0.000000e+00 : f32
      %34 = vector.broadcast %cst_18 : f32 to vector<1x128xf32>
      %35 = arith.maximumf %33, %34 : vector<1x128xf32>
      %cst_19 = arith.constant 9.99999974E-6 : f32
      %36 = vector.broadcast %cst_19 : f32 to vector<1x128xf32>
      %37 = arith.addf %35, %36 : vector<1x128xf32>
      %38 = math.rsqrt %37 : vector<1x128xf32>
      %39 = arith.mulf %24, %38 : vector<1x128xf32>
      %c0_20 = arith.constant 0 : index
      %c0_21 = arith.constant 0 : index
      %40 = vector.load %arg12[%c0_20, %c0_21] : memref<1x128xf32, #tpu.memory_space<vmem>>, vector<1x128xf32>
      tpu.vector_store %arg12[%c0_20, %c0_21], %39 {strides = array<i32>} : memref<1x128xf32, #tpu.memory_space<vmem>>, vector<1x128xf32>,
      %41 = arith.mulf %28, %39 : vector<1x128xf32>
      %42 = arith.subf %25, %41 : vector<1x128xf32>
      %c0_22 = arith.constant 0 : index
      %c0_23 = arith.constant 0 : index
      %43 = vector.load %arg13[%c0_22, %c0_23] : memref<1x128xf32, #tpu.memory_space<vmem>>, vector<1x128xf32>
      tpu.vector_store %arg13[%c0_22, %c0_23], %42 {strides = array<i32>} : memref<1x128xf32, #tpu.memory_space<vmem>>, vector<1x128xf32>,
      %cst_24 = arith.constant 0.000000e+00 : f32
      %44 = vector.broadcast %cst_24 : f32 to vector<1x128xf32>
      %c0_25 = arith.constant 0 : index
      %c0_26 = arith.constant 0 : index
      %45 = vector.load %arg10[%c0_25, %c0_26] : memref<1x128xf32, #tpu.memory_space<vmem>>, vector<1x128xf32>
      tpu.vector_store %arg10[%c0_25, %c0_26], %44 {strides = array<i32>} : memref<1x128xf32, #tpu.memory_space<vmem>>, vector<1x128xf32>,
      %cst_27 = arith.constant 0.000000e+00 : f32
      %46 = vector.broadcast %cst_27 : f32 to vector<1x128xf32>
      %c0_28 = arith.constant 0 : index
      %c0_29 = arith.constant 0 : index
      %47 = vector.load %arg11[%c0_28, %c0_29] : memref<1x128xf32, #tpu.memory_space<vmem>>, vector<1x128xf32>
      tpu.vector_store %arg11[%c0_28, %c0_29], %46 {strides = array<i32>} : memref<1x128xf32, #tpu.memory_space<vmem>>, vector<1x128xf32>,
    } else {
    }
    %c2_i32_10 = arith.constant 2 : i32
    %21 = arith.cmpi eq, %arg0, %c2_i32_10 : i32
    %22 = arith.extui %21 : i1 to i32
    %c0_i32_11 = arith.constant 0 : i32
    %23 = arith.cmpi ne, %22, %c0_i32_11 : i32
    scf.if %23 {
      %24 = arith.index_cast %arg1 : i32 to index
      %c0 = arith.constant 0 : index
      %c0_12 = arith.constant 0 : index
      %25 = vector.load %arg9[%24, %c0, %c0_12] : memref<1x8x128xf32, #tpu.memory_space<vmem>>, vector<1x8x128xf32>
      %26 = vector.shape_cast %25 : vector<1x8x128xf32> to vector<8x128xf32>
      %c0_13 = arith.constant 0 : index
      %c0_14 = arith.constant 0 : index
      %27 = vector.load %arg12[%c0_13, %c0_14] : memref<1x128xf32, #tpu.memory_space<vmem>>, vector<1x128xf32>
      %28 = vector.broadcast %27 : vector<1x128xf32> to vector<8x128xf32>
      %29 = arith.mulf %26, %28 : vector<8x128xf32>
      %c0_15 = arith.constant 0 : index
      %c0_16 = arith.constant 0 : index
      %30 = vector.load %arg13[%c0_15, %c0_16] : memref<1x128xf32, #tpu.memory_space<vmem>>, vector<1x128xf32>
      %31 = vector.broadcast %30 : vector<1x128xf32> to vector<8x128xf32>
      %32 = arith.addf %29, %31 : vector<8x128xf32>
      %33 = arith.truncf %32 : vector<8x128xf32> to vector<8x128xbf16>
      %c0_17 = arith.constant 0 : index
      %c0_18 = arith.constant 0 : index
      %34 = vector.load %arg5[%c0_17, %c0_18] : memref<128x128xbf16, #tpu.memory_space<vmem>>, vector<128x128xbf16>
      %cst = arith.constant dense<0.000000e+00> : vector<8x128xf32>
      %35 = tpu.matmul %33, %34, %cst {dimension_numbers = #tpu.dot_dimension_numbers<[1], [0], [0], [1], [0, 0, 1, 1], [], []>} : vector<8x128xbf16>, vector<128x128xbf16>, vector<8x128xf32> -> vector<8x128xf32>
      %c0_19 = arith.constant 0 : index
      %c0_20 = arith.constant 0 : index
      %36 = vector.load %arg7[%c0_19, %c0_20] : memref<8x128xf32, #tpu.memory_space<vmem>>, vector<8x128xf32>
      tpu.vector_store %arg7[%c0_19, %c0_20], %35 {strides = array<i32>} : memref<8x128xf32, #tpu.memory_space<vmem>>, vector<8x128xf32>,
    } else {
    }
    return
  }
  func.func @transform_0(%arg0: i32, %arg1: i32) -> (i32, i32) {
    %c0_i32 = arith.constant 0 : i32
    %0 = arith.cmpi eq, %arg0, %c0_i32 : i32
    %c0_i32_0 = arith.constant 0 : i32
    %1 = arith.select %0, %arg1, %c0_i32_0 : i32
    %c0_i32_1 = arith.constant 0 : i32
    %c0_i32_2 = arith.constant 0 : i32
    return %1, %c0_i32_1 : i32, i32
  }
  func.func @transform_1(%arg0: i32, %arg1: i32) -> (i32, i32) {
    %c0_i32 = arith.constant 0 : i32
    %c0_i32_0 = arith.constant 0 : i32
    %c0_i32_1 = arith.constant 0 : i32
    return %c0_i32, %c0_i32_0 : i32, i32
  }
  func.func @transform_2(%arg0: i32, %arg1: i32) -> (i32, i32) {
    %c0_i32 = arith.constant 0 : i32
    %c0_i32_0 = arith.constant 0 : i32
    %c0_i32_1 = arith.constant 0 : i32
    return %c0_i32, %c0_i32_0 : i32, i32
  }
  func.func @transform_3(%arg0: i32, %arg1: i32) -> (i32, i32) {
    %c0_i32 = arith.constant 0 : i32
    %c0_i32_0 = arith.constant 0 : i32
    %c0_i32_1 = arith.constant 0 : i32
    return %c0_i32, %c0_i32_0 : i32, i32
  }
  func.func @transform_4(%arg0: i32, %arg1: i32) -> (i32, i32) {
    %c0_i32 = arith.constant 0 : i32
    %c0_i32_0 = arith.constant 0 : i32
    %c0_i32_1 = arith.constant 0 : i32
    return %c0_i32, %c0_i32_0 : i32, i32
  }
  func.func @transform_5(%arg0: i32, %arg1: i32) -> (i32, i32) {
    %c2_i32 = arith.constant 2 : i32
    %0 = arith.cmpi eq, %arg0, %c2_i32 : i32
    %c0_i32 = arith.constant 0 : i32
    %1 = arith.select %0, %arg1, %c0_i32 : i32
    %c0_i32_0 = arith.constant 0 : i32
    %c0_i32_1 = arith.constant 0 : i32
    return %1, %c0_i32_0 : i32, i32
  }
}

</mosaic_0001>

<bundles_post_ra>
// kernel: mlp_linear_forward.1
= control target key start
LH: loop header
LB: loop body
LE: loop exit
PB: predicated region body
PF: predicated region fallthrough
CT: control target
= control target key end

     0   :  { %10 = vsyncpa [#allocation9], 0  ;;  %s1912_s0 = inlined_call_operand.vmem [shape: f32[8,784], index: 0, kind: input, shape index: {}]   ;;  %s1913_s1 = inlined_call_operand.vmem [shape: bf16[784,128], index: 1, kind: input, shape index: {}]   ;;  %s1914_s2 = inlined_call_operand.vmem [shape: bf16[128,128], index: 2, kind: input, shape index: {}]   ;;  %s1915_s3 = inlined_call_operand.vmem [shape: bf16[128,128], index: 3, kind: input, shape index: {}]   ;;  %s1916_s4 = inlined_call_operand.vmem [shape: f32[8,128], index: 4, kind: input, shape index: {}]   ;;  %s1917_s5 = inlined_call_operand.hbm [shape: f32[8,128], index: 5, kind: output, shape index: {}]  }
   0x1   :  { %12 = vsyncpa [#allocation9 + $0x1], 0  ;;  %s1639_s18 = smov 0   ;;  %s1641_s19 = smov 0  }
   0x2   :  { %s1643_s20 = smov 0  }
   0x3 LB: > { %s1157_s21 = sadd.s32 4294967295, %s1603_s20   ;;  %s1158_s22 = sadd.s32 4294967294, %s1603_s20   ;;  %s1603_s20 = sphi %s1643_s20, %s18_s20   ;;  %s1599_s19 = sphi %s1641_s19, %s1919_s19   ;;  %s1595_s18 = sphi %s1639_s18, %s1918_s18  }
   0x4   : > { %s30_s23 = sadd.s32 1, %s1599_s19  ;;  %p1162_p0 = scmp.ge.s32.totalorder %s1603_s20, 1 }
   0x5   : > { %p32_p1 = scmp.ge.s32.totalorder %s30_s23, 3  ;;  %p214_p2 = scmp.lt.s32.totalorder %s1603_s20, 4 }
   0x7   : > { %s1921_s23 = smov (%p32_p1, %s30_s23), 0  ;;  %p215_p3 = pnand %p1162_p0, %p214_p2 }
   0x8   : > { %p256_p4 = scmp.eq.s32.totalorder (!%p215_p3), %s1595_s18, 0 }
   0x9   : > { %218 = sbr.rel (%p215_p3) target bundleno = 678 (0x2a6), region = 40 }
   0xe   : > { %261 = sbr.rel (!%p256_p4) target bundleno = 19 (0x13), region = 44  ;;  %v1605_v0 = vmov (%p256_p4), 0.0  }
   0xf   : > { %262 = vst [vmem:[#allocation4] sm:$0x1] (%p256_p4), %v1605_v0 }
  0x10   : > { %263 = vst [vmem:[#allocation5] sm:$0x1] (%p256_p4), %v1605_v0 }
  0x13 PF: > { %p1164_p5 = scmp.ne.s32.totalorder %s1595_s18, 0 }
  0x15   : > { %266 = sbr.rel (%p1164_p5) target bundleno = 239 (0xef), region = 48 }
  0x1a   : > { %v1442_v1 = vld [vmem:[%s1913_s1 + $0x38] sm:$0xff]  ;;  %v1441_v4 = vld [vmem:[%s1913_s1 + $0x30] sm:$0xff]  ;;  %v1440_v9 = vld [vmem:[%s1913_s1 + $0x28] sm:$0xff]  ;;  %vm673_vm0 = vcmask 130048  }
  0x1b   : > { %v1450_v2 = vld [vmem:[%s1913_s1 + $0x78] sm:$0xff]  ;;  %677 = vmatpush.bf16.msra.mxu0 %v1442_v1  ;;  %v1449_v5 = vld [vmem:[%s1913_s1 + $0x70] sm:$0xff]  ;;  %v1448_v10 = vld [vmem:[%s1913_s1 + $0x68] sm:$0xff] }
  0x1c   : > { %v1458_v3 = vld [vmem:[%s1913_s1 + $0xb8] sm:$0xff]  ;;  %690 = vmatpush.bf16.msra.mxu1 %v1450_v2  ;;  %v1457_v6 = vld [vmem:[%s1913_s1 + $0xb0] sm:$0xff]  ;;  %v1456_v11 = vld [vmem:[%s1913_s1 + $0xa8] sm:$0xff] }
  0x1d   : > { %703 = vmatpush.bf16.msra.mxu2 %v1458_v3  ;;  %v1466_v7 = vld [vmem:[%s1913_s1 + $0xf8] sm:$0xff]  ;;  %v1465_v8 = vld [vmem:[%s1913_s1 + $0xf0] sm:$0xff]  ;;  %v1464_v12 = vld [vmem:[%s1913_s1 + $0xe8] sm:$0xff] }
  0x1e   : > { %716 = vmatpush.bf16.msra.mxu3 %v1466_v7  ;;  %v1439_v13 = vld [vmem:[%s1913_s1 + $0x20] sm:$0xff]  ;;  %v1438_v17 = vld [vmem:[%s1913_s1 + $0x18] sm:$0xff]  ;;  %v1437_v21 = vld [vmem:[%s1913_s1 + $0x10] sm:$0xff] }
  0x1f   : > { %678 = vmatpush.bf16.msra.mxu0 %v1441_v4  ;;  %v1447_v14 = vld [vmem:[%s1913_s1 + $0x60] sm:$0xff]  ;;  %v1446_v18 = vld [vmem:[%s1913_s1 + $0x58] sm:$0xff]  ;;  %v1445_v22 = vld [vmem:[%s1913_s1 + $0x50] sm:$0xff] }
  0x20   : > { %691 = vmatpush.bf16.msra.mxu1 %v1449_v5  ;;  %v1455_v15 = vld [vmem:[%s1913_s1 + $0xa0] sm:$0xff]  ;;  %v1454_v19 = vld [vmem:[%s1913_s1 + $0x98] sm:$0xff]  ;;  %v1453_v23 = vld [vmem:[%s1913_s1 + $0x90] sm:$0xff] }
  0x21   : > { %704 = vmatpush.bf16.msra.mxu2 %v1457_v6  ;;  %v1463_v16 = vld [vmem:[%s1913_s1 + $0xe0] sm:$0xff]  ;;  %v1462_v20 = vld [vmem:[%s1913_s1 + $0xd8] sm:$0xff]  ;;  %v1461_v24 = vld [vmem:[%s1913_s1 + $0xd0] sm:$0xff] }
  0x22   : > { %717 = vmatpush.bf16.msra.mxu3 %v1465_v8  ;;  %v1436_v25 = vld [vmem:[%s1913_s1 + $0x8] sm:$0xff]  ;;  %v1435_v28 = vld [vmem:[%s1913_s1] sm:$0xff]  ;;  %v1474_v33 = vld [vmem:[%s1913_s1 + $0x138] sm:$0xff] }
  0x23   : > { %679 = vmatpush.bf16.msra.mxu0 %v1440_v9  ;;  %v1444_v26 = vld [vmem:[%s1913_s1 + $0x48] sm:$0xff]  ;;  %v1443_v30 = vld [vmem:[%s1913_s1 + $0x40] sm:$0xff]  ;;  %v1482_v34 = vld [vmem:[%s1913_s1 + $0x178] sm:$0xff] }
  0x24   : > { %692 = vmatpush.bf16.msra.mxu1 %v1448_v10  ;;  %v1452_v27 = vld [vmem:[%s1913_s1 + $0x88] sm:$0xff]  ;;  %v267_v31 = vld [vmem:[%s1912_s0] sm:$0xff]  ;;  %v269_v36 = vld [vmem:[%s1912_s0 + $0x10] sm:$0xff] }
  0x25   : > { %705 = vmatpush.bf16.msra.mxu2 %v1456_v11  ;;  %v1460_v29 = vld [vmem:[%s1913_s1 + $0xc8] sm:$0xff]  ;;  %v1451_v35 = vld [vmem:[%s1913_s1 + $0x80] sm:$0xff]  ;;  %v274_v37 = vpack.c.bf16 %v267_v31, %v267_v31  ;;  %v270_v40 = vld [vmem:[%s1912_s0 + $0x18] sm:$0xff]  ;;  %v276_v44 = vpack.c.bf16 %v269_v36, %v269_v36 }
  0x26   : > { %718 = vmatpush.bf16.msra.mxu3 %v1464_v12  ;;  %v268_v32 = vld [vmem:[%s1912_s0 + $0x8] sm:$0xff]  ;;  %v1459_v39 = vld [vmem:[%s1913_s1 + $0xc0] sm:$0xff]  ;;  %v1473_v42 = vld [vmem:[%s1913_s1 + $0x130] sm:$0xff]  ;;  %v277_v45 = vpack.c.bf16 %v270_v40, %v270_v40 }
  0x27   : > { %680 = vmatpush.bf16.msra.mxu0 %v1439_v13  ;;  %v275_v38 = vpack.c.bf16 %v268_v32, %v268_v32  ;;  %v1483_v41 = vld [vmem:[%s1913_s1 + $0x180] sm:$0xff]  ;;  %v1481_v43 = vld [vmem:[%s1913_s1 + $0x170] sm:$0xff]  ;;  %v1472_v46 = vld [vmem:[%s1913_s1 + $0x128] sm:$0xff] }
  0x28   : > { %693 = vmatpush.bf16.msra.mxu1 %v1447_v14  ;;  %v1480_v47 = vld [vmem:[%s1913_s1 + $0x168] sm:$0xff]  ;;  %v1471_v48 = vld [vmem:[%s1913_s1 + $0x120] sm:$0xff]  ;;  %v1470_v50 = vld [vmem:[%s1913_s1 + $0x118] sm:$0xff] }
  0x29   : > { %706 = vmatpush.bf16.msra.mxu2 %v1455_v15  ;;  %v1479_v49 = vld [vmem:[%s1913_s1 + $0x160] sm:$0xff]  ;;  %v1478_v51 = vld [vmem:[%s1913_s1 + $0x158] sm:$0xff]  ;;  %v273_v52 = vld [vmem:[%s1912_s0 + $0x30] sm:$0xff] }
  0x2a   : > { %719 = vmatpush.bf16.msra.mxu3 %v1463_v16  ;;  %v1469_v53 = vld [vmem:[%s1913_s1 + $0x110] sm:$0xff]  ;;  %v280_v55 = vpack.c.bf16 %v273_v52, %v273_v52  ;;  %v1468_v56 = vld [vmem:[%s1913_s1 + $0x108] sm:$0xff]  ;;  %v1467_v58 = vld [vmem:[%s1913_s1 + $0x100] sm:$0xff] }
  0x2b   : > { %681 = vmatpush.bf16.msra.mxu0 %v1438_v17  ;;  %v1477_v54 = vld [vmem:[%s1913_s1 + $0x150] sm:$0xff]  ;;  %v1476_v57 = vld [vmem:[%s1913_s1 + $0x148] sm:$0xff]  ;;  %v1475_v59 = vld [vmem:[%s1913_s1 + $0x140] sm:$0xff] }
  0x2c   : > { %694 = vmatpush.bf16.msra.mxu1 %v1446_v18  ;;  %v271_v60 = vld [vmem:[%s1912_s0 + $0x20] sm:$0xff]  ;;  %v272_v61 = vld [vmem:[%s1912_s0 + $0x28] sm:$0xff] }
  0x2d   : > { %707 = vmatpush.bf16.msra.mxu2 %v1454_v19  ;;  %v278_v62 = vpack.c.bf16 %v271_v60, %v271_v60  ;;  %v279_v63 = vpack.c.bf16 %v272_v61, %v272_v61 }
  0x2e   : > { %720 = vmatpush.bf16.msra.mxu3 %v1462_v20 }
  0x2f   : > { %682 = vmatpush.bf16.msra.mxu0 %v1437_v21 }
  0x30   : > { %695 = vmatpush.bf16.msra.mxu1 %v1445_v22 }
  0x31   : > { %708 = vmatpush.bf16.msra.mxu2 %v1453_v23 }
  0x32   : > { %721 = vmatpush.bf16.msra.mxu3 %v1461_v24 }
  0x33   : > { %683 = vmatpush.bf16.msra.mxu0 %v1436_v25 }
  0x34   : > { %696 = vmatpush.bf16.msra.mxu1 %v1444_v26 }
  0x35   : > { %709 = vmatpush.bf16.msra.mxu2 %v1452_v27 }
  0x36   : > { %722 = vmatpush.bf16.msra.mxu3 %v1460_v29 }
  0x37   : > { %684 = vmatpush.bf16.msra.mxu0 %v1435_v28 }
  0x38   : > { %697 = vmatpush.bf16.msra.mxu1 %v1443_v30  ;;  %v771_v30 = vld [vmem:[#allocation4] sm:$0x1] }
  0x39   : > { %710 = vmatpush.bf16.msra.mxu2 %v1451_v35 }
  0x3a   : > { %685 = vmatmul.bf16.vlgmr.msra.gmra.mxu0 %v274_v37  ;;  %723 = vmatpush.bf16.msra.mxu3 %v1459_v39 }
  0x3b   : > { %729 = vmatpush.bf16.msrb.mxu0 %v1474_v33  ;;  %698 = vmatmul.bf16.vlgmr.msra.gmra.mxu1 %v275_v38  ;;  %v780_v33 = vld [vmem:[#allocation5] sm:$0x1] }
  0x3c   : > { %742 = vmatpush.bf16.msrb.mxu1 %v1482_v34  ;;  %711 = vmatmul.bf16.vlgmr.msra.gmra.mxu2 %v276_v44 }
  0x3d   : > { %762 = vmatpush.bf16.msrb.mxu2 %v1483_v41  ;;  %724 = vmatmul.bf16.vlgmr.msra.gmra.mxu3 %v277_v45 }
  0x3f   : > { %730 = vmatpush.bf16.msrb.mxu0 %v1473_v42 }
  0x40   : > { %743 = vmatpush.bf16.msrb.mxu1 %v1481_v43 }
  0x43   : > { %731 = vmatpush.bf16.msrb.mxu0 %v1472_v46 }
  0x44   : > { %744 = vmatpush.bf16.msrb.mxu1 %v1480_v47 }
  0x47   : > { %732 = vmatpush.bf16.msrb.mxu0 %v1471_v48 }
  0x48   : > { %745 = vmatpush.bf16.msrb.mxu1 %v1479_v49 }
  0x4b   : > { %733 = vmatpush.bf16.msrb.mxu0 %v1470_v50 }
  0x4c   : > { %746 = vmatpush.bf16.msrb.mxu1 %v1478_v51  ;;  %1361 = vmatmul.msk.bf16.vlgmr.msrb.gmra.mxu2 %vm673_vm0, %v280_v55 }
  0x4f   : > { %734 = vmatpush.bf16.msrb.mxu0 %v1469_v53 }
  0x50   : > { %747 = vmatpush.bf16.msrb.mxu1 %v1477_v54 }
  0x53   : > { %735 = vmatpush.bf16.msrb.mxu0 %v1468_v56 }
  0x54   : > { %748 = vmatpush.bf16.msrb.mxu1 %v1476_v57 }
  0x57   : > { %736 = vmatpush.bf16.msrb.mxu0 %v1467_v58 }
  0x58   : > { %749 = vmatpush.bf16.msrb.mxu1 %v1475_v59 }
  0x5a   : > { %737 = vmatmul.bf16.vlgmr.msrb.gmra.mxu0 %v278_v62 }
  0x5b   : > { %750 = vmatmul.bf16.vlgmr.msrb.gmra.mxu1 %v279_v63 }
  0xb7   : > { %v686_v0 = vpop.f32.mrf.mxu0 }
  0xb8   : > { %v699_v1 = vpop.f32.mrf.mxu1 }
  0xb9   : > { %v700_v8 = vadd.f32 %v699_v1, %v686_v0 }
  0xbf   : > { %v688_v2 = vpop.f32.mrf.mxu0  ;;  %v712_v4 = vpop.f32.mrf.mxu2 }
  0xc0   : > { %v701_v3 = vpop.f32.mrf.mxu1  ;;  %v725_v5 = vpop.f32.mrf.mxu3  ;;  %v713_v9 = vadd.f32 %v712_v4, %v700_v8 }
  0xc2   : > { %v726_v11 = vadd.f32 %v725_v5, %v713_v9 }
  0xc7   : > { %v714_v6 = vpop.f32.mrf.mxu2 }
  0xc8   : > { %v727_v7 = vpop.f32.mrf.mxu3 }
  0xcf   : > { %v764_v10 = vpop.f32.mrf.mxu2 }
  0xd7   : > { %v738_v12 = vpop.f32.mrf.mxu0  ;;  %v766_v16 = vpop.f32.mrf.mxu2 }
  0xd8   : > { %v751_v13 = vpop.f32.mrf.mxu1  ;;  %v739_v14 = vadd.f32 %v738_v12, %v726_v11 }
  0xda   : > { %v752_v15 = vadd.f32 %v751_v13, %v739_v14 }
  0xdc   : > { %v765_v17 = vadd.f32 %v764_v10, %v752_v15 }
  0xde   : > { %770 = vst [vmem:[#allocation2] sm:$0xff] %v765_v17  ;;  %v772_v18 = vrot.slane %v765_v17, 4  ;;  %v781_v19 = vmul.f32 %v765_v17, %v765_v17 }
  0xdf   : > { %v740_v20 = vpop.f32.mrf.mxu0 }
  0xe0   : > { %v753_v21 = vpop.f32.mrf.mxu1  ;;  %v773_v22 = vadd.f32 %v772_v18, %v765_v17  ;;  %v782_v23 = vrot.slane %v781_v19, 4 }
  0xe2   : > { %v774_v24 = vrot.slane %v773_v22, 2  ;;  %v783_v25 = vadd.f32 %v782_v23, %v781_v19 }
  0xe4   : > { %v775_v26 = vadd.f32 %v774_v24, %v773_v22  ;;  %v784_v27 = vrot.slane %v783_v25, 2 }
  0xe6   : > { %v776_v28 = vrot.slane %v775_v26, 1  ;;  %v785_v29 = vadd.f32 %v784_v27, %v783_v25 }
  0xe8   : > { %v777_v31 = vadd.f32 %v776_v28, %v775_v26  ;;  %v786_v32 = vrot.slane %v785_v29, 1 }
  0xea   : > { %v778_v34 = vadd.f32 %v777_v31, %v771_v30  ;;  %v787_v35 = vadd.f32 %v786_v32, %v785_v29 }
  0xec   : > { %779 = vst [vmem:[#allocation4] sm:$0x1] %v778_v34  ;;  %v788_v36 = vadd.f32 %v787_v35, %v780_v33 }
  0xee   : > { %789 = vst [vmem:[#allocation5] sm:$0x1] %v788_v36 }
  0xef PF: > { %p790_p6 = scmp.eq.s32.totalorder %s1595_s18, 1 }
  0xf0   : > { %v1606_v42 = vmov (%p790_p6), 0.0   ;;  %v795_v51 = vld [vmem:[%s1916_s4] sm:$0x1] (%p790_p6)  ;;  %v796_v55 = vld [vmem:[%s1916_s4 + $0x1] sm:$0x1] (%p790_p6) }
  0xf1   : > { %794 = sbr.rel (!%p790_p6) target bundleno = 279 (0x117), region = 52 }
  0xf3   : > { %v797_v37 = vld [vmem:[#allocation4] sm:$0x1] (%p790_p6) }
  0xf4   : > { %v798_v39 = vmul.f32 (%p790_p6), 0.125, %v797_v37  ;;  %820 = vst [vmem:[#allocation4] sm:$0x1] (%p790_p6), %v1606_v42 }
  0xf5   : > { %v799_v38 = vld [vmem:[#allocation5] sm:$0x1] (%p790_p6) }
  0xf6   : > { %v800_v40 = vmul.f32 0.125, %v799_v38  ;;  %v801_v41 = vmul.f32 %v798_v39, %v798_v39  ;;  %821 = vst [vmem:[#allocation5] sm:$0x1] %v1606_v42 }
  0xf8   : > { %v802_v43 = vsub.f32 %v800_v40, %v801_v41 }
  0xfa   : > { %v803_v44 = vmax.f32 %v802_v43, 0.0 }
  0xfc   : > { %v804_v45 = vadd.f32 1e-05, %v803_v44 }
  0xfe   : > { %1541 = vrsqrt.f32 %v804_v45  ;;  %vm811_vm1 = vweird.f32 %v804_v45 }
 0x104   : > { %v1542_v46 = vpop.eup %1541 }
 0x105   : > { %v806_v47 = vmul.f32 %v1542_v46, %v804_v45  ;;  %vm812_vm2 = vweird.f32 %v1542_v46 }
 0x106   : > { %vm813_vm3 = vmor %vm811_vm1, %vm812_vm2 }
 0x107   : > { %v807_v48 = vmul.f32 %v1542_v46, %v806_v47 }
 0x109   : > { %v808_v49 = vmul.f32 0.5, %v807_v48 }
 0x10b   : > { %v809_v50 = vsub.f32 1.5, %v808_v49 }
 0x10d   : > { %v810_v52 = vmul.f32 %v1542_v46, %v809_v50 }
 0x10f   : > { %v814_v53 = vsel %vm813_vm3, %v1542_v46, %v810_v52 }
 0x110   : > { %v815_v54 = vmul.f32 %v814_v53, %v795_v51 }
 0x112   : > { %816 = vst [vmem:[#allocation6] sm:$0x1] %v815_v54  ;;  %v817_v56 = vmul.f32 %v815_v54, %v798_v39 }
 0x114   : > { %v818_v57 = vsub.f32 %v796_v55, %v817_v56 }
 0x116   : > { %819 = vst [vmem:[#allocation7] sm:$0x1] %v818_v57 }
 0x117 PF: > { %p1363_p7 = scmp.ne.s32.totalorder %s1595_s18, 1 }
 0x119   : > { %824 = sbr.rel (%p1363_p7) target bundleno = 461 (0x1cd), region = 56 }
 0x11e   : > { %v1492_v58 = vld [vmem:[%s1914_s2 + $0x38] sm:$0xff]  ;;  %v1491_v59 = vld [vmem:[%s1914_s2 + $0x30] sm:$0xff]  ;;  %v1490_v60 = vld [vmem:[%s1914_s2 + $0x28] sm:$0xff] }
 0x11f   : > { %903 = vmatpush.bf16.msra.mxu0 %v1492_v58  ;;  %v1489_v61 = vld [vmem:[%s1914_s2 + $0x20] sm:$0xff]  ;;  %v1488_v62 = vld [vmem:[%s1914_s2 + $0x18] sm:$0xff]  ;;  %v1543_v63 = vld [vmem:[#allocation6] ss:$0 sm:$0xff] }
 0x120   : > { %v1487_v0 = vld [vmem:[%s1914_s2 + $0x10] sm:$0xff]  ;;  %v827_v1 = vld [vmem:[#allocation2] sm:$0xff]  ;;  %v1486_v4 = vld [vmem:[%s1914_s2 + $0x8] sm:$0xff] }
 0x121   : > { %v832_v2 = vmul.f32 %v1543_v63, %v827_v1  ;;  %v1544_v3 = vld [vmem:[#allocation7] ss:$0 sm:$0xff]  ;;  %v1485_v6 = vld [vmem:[%s1914_s2] sm:$0xff]  ;;  %v918_v20 = vld [vmem:[#allocation4] sm:$0x1] }
 0x122   : > { %v927_v23 = vld [vmem:[#allocation5] sm:$0x1] }
 0x123   : > { %904 = vmatpush.bf16.msra.mxu0 %v1491_v59  ;;  %v837_v5 = vadd.f32 %v1544_v3, %v832_v2 }
 0x125   : > { %v838_v7 = vpack.c.bf16 %v837_v5, %v837_v5 }
 0x127   : > { %905 = vmatpush.bf16.msra.mxu0 %v1490_v60 }
 0x12b   : > { %906 = vmatpush.bf16.msra.mxu0 %v1489_v61 }
 0x12f   : > { %907 = vmatpush.bf16.msra.mxu0 %v1488_v62 }
 0x133   : > { %908 = vmatpush.bf16.msra.mxu0 %v1487_v0 }
 0x137   : > { %909 = vmatpush.bf16.msra.mxu0 %v1486_v4 }
 0x13b   : > { %910 = vmatpush.bf16.msra.mxu0 %v1485_v6 }
 0x13e   : > { %911 = vmatmul.bf16.vlgmr.msra.gmra.mxu0 %v838_v7 }
 0x1bb   : > { %v912_v8 = vpop.f32.mrf.mxu0 }
 0x1bc   : > { %917 = vst [vmem:[#allocation3] sm:$0xff] %v912_v8  ;;  %v919_v9 = vrot.slane %v912_v8, 4  ;;  %v928_v10 = vmul.f32 %v912_v8, %v912_v8 }
 0x1be   : > { %v920_v11 = vadd.f32 %v919_v9, %v912_v8  ;;  %v929_v12 = vrot.slane %v928_v10, 4 }
 0x1c0   : > { %v921_v13 = vrot.slane %v920_v11, 2  ;;  %v930_v14 = vadd.f32 %v929_v12, %v928_v10 }
 0x1c2   : > { %v922_v15 = vadd.f32 %v921_v13, %v920_v11  ;;  %v931_v16 = vrot.slane %v930_v14, 2 }
 0x1c3   : > { %v914_v17 = vpop.f32.mrf.mxu0 }
 0x1c4   : > { %v923_v18 = vrot.slane %v922_v15, 1  ;;  %v932_v19 = vadd.f32 %v931_v16, %v930_v14 }
 0x1c6   : > { %v924_v21 = vadd.f32 %v923_v18, %v922_v15  ;;  %v933_v22 = vrot.slane %v932_v19, 1 }
 0x1c8   : > { %v925_v24 = vadd.f32 %v924_v21, %v918_v20  ;;  %v934_v25 = vadd.f32 %v933_v22, %v932_v19 }
 0x1ca   : > { %926 = vst [vmem:[#allocation4] sm:$0x1] %v925_v24  ;;  %v935_v26 = vadd.f32 %v934_v25, %v927_v23 }
 0x1cc   : > { %936 = vst [vmem:[#allocation5] sm:$0x1] %v935_v26 }
 0x1cd PF: > { %p937_p8 = scmp.eq.s32.totalorder %s1595_s18, 2 }
 0x1ce   : > { %v1607_v32 = vmov (%p937_p8), 0.0   ;;  %v942_v41 = vld [vmem:[%s1916_s4 + $0x2] sm:$0x1] (%p937_p8)  ;;  %v943_v45 = vld [vmem:[%s1916_s4 + $0x3] sm:$0x1] (%p937_p8) }
 0x1cf   : > { %941 = sbr.rel (!%p937_p8) target bundleno = 501 (0x1f5), region = 60 }
 0x1d1   : > { %v944_v27 = vld [vmem:[#allocation4] sm:$0x1] (%p937_p8) }
 0x1d2   : > { %v945_v29 = vmul.f32 (%p937_p8), 0.125, %v944_v27  ;;  %967 = vst [vmem:[#allocation4] sm:$0x1] (%p937_p8), %v1607_v32 }
 0x1d3   : > { %v946_v28 = vld [vmem:[#allocation5] sm:$0x1] (%p937_p8) }
 0x1d4   : > { %v947_v30 = vmul.f32 0.125, %v946_v28  ;;  %v948_v31 = vmul.f32 %v945_v29, %v945_v29  ;;  %968 = vst [vmem:[#allocation5] sm:$0x1] %v1607_v32 }
 0x1d6   : > { %v949_v33 = vsub.f32 %v947_v30, %v948_v31 }
 0x1d8   : > { %v950_v34 = vmax.f32 %v949_v33, 0.0 }
 0x1da   : > { %v951_v35 = vadd.f32 1e-05, %v950_v34 }
 0x1dc   : > { %1545 = vrsqrt.f32 %v951_v35  ;;  %vm958_vm4 = vweird.f32 %v951_v35 }
 0x1e2   : > { %v1546_v36 = vpop.eup %1545 }
 0x1e3   : > { %v953_v37 = vmul.f32 %v1546_v36, %v951_v35  ;;  %vm959_vm5 = vweird.f32 %v1546_v36 }
 0x1e4   : > { %vm960_vm6 = vmor %vm958_vm4, %vm959_vm5 }
 0x1e5   : > { %v954_v38 = vmul.f32 %v1546_v36, %v953_v37 }
 0x1e7   : > { %v955_v39 = vmul.f32 0.5, %v954_v38 }
 0x1e9   : > { %v956_v40 = vsub.f32 1.5, %v955_v39 }
 0x1eb   : > { %v957_v42 = vmul.f32 %v1546_v36, %v956_v40 }
 0x1ed   : > { %v961_v43 = vsel %vm960_vm6, %v1546_v36, %v957_v42 }
 0x1ee   : > { %v962_v44 = vmul.f32 %v961_v43, %v942_v41 }
 0x1f0   : > { %963 = vst [vmem:[#allocation6] sm:$0x1] %v962_v44  ;;  %v964_v46 = vmul.f32 %v962_v44, %v945_v29 }
 0x1f2   : > { %v965_v47 = vsub.f32 %v943_v45, %v964_v46 }
 0x1f4   : > { %966 = vst [vmem:[#allocation7] sm:$0x1] %v965_v47 }
 0x1f5 PF: > { %p1397_p9 = scmp.ne.s32.totalorder %s1595_s18, 2 }
 0x1f7   : > { %971 = sbr.rel (%p1397_p9) target bundleno = 674 (0x2a2), region = 64 }
 0x1fc   : > { %v1501_v48 = vld [vmem:[%s1915_s3 + $0x38] sm:$0xff]  ;;  %v1500_v49 = vld [vmem:[%s1915_s3 + $0x30] sm:$0xff]  ;;  %v1499_v50 = vld [vmem:[%s1915_s3 + $0x28] sm:$0xff] }
 0x1fd   : > { %1050 = vmatpush.bf16.msra.mxu0 %v1501_v48  ;;  %v1498_v51 = vld [vmem:[%s1915_s3 + $0x20] sm:$0xff]  ;;  %v1497_v52 = vld [vmem:[%s1915_s3 + $0x18] sm:$0xff]  ;;  %v1547_v53 = vld [vmem:[#allocation6] ss:$0 sm:$0xff] }
 0x1fe   : > { %v1496_v54 = vld [vmem:[%s1915_s3 + $0x10] sm:$0xff]  ;;  %v974_v55 = vld [vmem:[#allocation3] sm:$0xff]  ;;  %v1494_v60 = vld [vmem:[%s1915_s3] sm:$0xff] }
 0x1ff   : > { %v979_v56 = vmul.f32 %v1547_v53, %v974_v55  ;;  %v1548_v57 = vld [vmem:[#allocation7] ss:$0 sm:$0xff]  ;;  %v1495_v58 = vld [vmem:[%s1915_s3 + $0x8] sm:$0xff] }
 0x201   : > { %1051 = vmatpush.bf16.msra.mxu0 %v1500_v49  ;;  %v984_v59 = vadd.f32 %v1548_v57, %v979_v56 }
 0x203   : > { %v985_v61 = vpack.c.bf16 %v984_v59, %v984_v59 }
 0x205   : > { %1052 = vmatpush.bf16.msra.mxu0 %v1499_v50 }
 0x209   : > { %1053 = vmatpush.bf16.msra.mxu0 %v1498_v51 }
 0x20d   : > { %1054 = vmatpush.bf16.msra.mxu0 %v1497_v52 }
 0x211   : > { %1055 = vmatpush.bf16.msra.mxu0 %v1496_v54 }
 0x215   : > { %1056 = vmatpush.bf16.msra.mxu0 %v1495_v58 }
 0x219   : > { %1057 = vmatpush.bf16.msra.mxu0 %v1494_v60 }
 0x21c   : > { %1058 = vmatmul.bf16.vlgmr.msra.gmra.mxu0 %v985_v61 }
 0x299   : > { %v1059_v62 = vpop.f32.mrf.mxu0 }
 0x29a   : > { %1063 = vst [vmem:[#allocation8] sm:$0xff] %v1059_v62 }
 0x2a1   : > { %v1061_v63 = vpop.f32.mrf.mxu0 }
 0x2a2 PF: > { %p1510_p10 = scmp.eq.s32.totalorder %s1157_s21, 2  ;;  %s1081_s25 = sshll.u32 %s1917_s5, 4  ;;  %s1082_s25 = int_to_ptr.hbm [resolvable:$true] %s1081_s25 }
 0x2a3   : > { %s1608_s26 = smov [#allocation8]  }
 0x2a4   : > { %s1079_s27 = sshll.u32 %s1608_s26, 4  ;;  %s1080_s27 = int_to_ptr.vmem [resolvable:$true] %s1079_s27 }
 0x2a5   : > { %1503 = dma.vmem_to_hbm [thread:$0]  (%p1510_p10), %s1080_s27, 128, %s1082_s25, [#allocation9]  }
 0x2a6 PF: > { %p1511_p11 = scmp.ge.s32.totalorder %s1603_s20, 2  ;;  %p1512_p12 = scmp.eq.s32.totalorder %s1158_s22, 2 }
 0x2a8   : > { %p1507_p13 = pnand %p1512_p12, %p1511_p11 }
 0x2aa   : > { %p1508_p0 = pneg %p1507_p13 }
 0x2ac   : > { %1590 = dma.done.wait (%p1508_p0), [#allocation9], 128  }
 0x2ad   : > { %1592 = vsyncadd (%p1508_p0), [#allocation9], 4294967168  ;;  %s18_s20 = sadd.s32 1, %s1603_s20   ;;  %s1918_s18 = smov %s1599_s19 }
 0x2ae   : > { %p15_p1 = scmp.ge.s32.totalorder %s18_s20, 5   ;;  %s1919_s19 = smov %s1921_s23 }
 0x2b0   :  { %17 = sbr.rel (!%p15_p1) target bundleno = 3 (0x3), region = 103 }
 0x2b5   :  { %1100 = vsyncpa [#allocation9], 1 }
 0x2b6   :  { %1102 = vsyncpa [#allocation9 + $0x1], 1 }

</bundles_post_ra>
